<compile_context>
chip_gen: v7x
topology: tpu7x:2x2x1
jax: 0.10.0
libtpu: 0.0.40
codegen_flags: <defaults>
</compile_context>

<pallas_src>
import functools

import jax
import jax.numpy as jnp
from jax import lax
from jax.experimental import pallas as pl
from jax.experimental.pallas import tpu as pltpu


def attention_pool_kernel(x_ref, w_ref, out_ref, m_sc, l_sc, acc_sc,
                          *, n_valid, tn, needs_mask):
    # x_ref:   (TN, D)  tile of node features (streamed)
    # w_ref:   (D, 1)   projection weight (resident across grid steps)
    # out_ref: (1, D)   pooled graph embedding (written on last step)
    # m_sc:    (1, 1)   running max of scores              (f32 scratch)
    # l_sc:    (1, 1)   running softmax denominator        (f32 scratch)
    # acc_sc:  (1, D)   running un-normalized weighted sum (f32 scratch)
    i = pl.program_id(0)

    @pl.when(i == 0)
    def _():
        m_sc[...] = jnp.full_like(m_sc, -jnp.inf)
        l_sc[...] = jnp.zeros_like(l_sc)
        acc_sc[...] = jnp.zeros_like(acc_sc)

    x = x_ref[...]                                              # (TN, D)
    # Attention scores for this tile: x @ w -> (TN, 1), f32 accumulate on MXU.
    scores = jnp.dot(x, w_ref[...], preferred_element_type=jnp.float32)

    if needs_mask:
        # Only the last tile can be partial (grid = cdiv(N, tn)); its
        # out-of-bounds rows hold unspecified data.  Mask the scores to -inf
        # (drops them from the max and the denominator) AND zero the x rows
        # (exp gives 0 for the masked scores, but 0 * NaN/Inf garbage would
        # poison the pooled contraction).  All-true on full tiles; a (TN,1)
        # column + one (TN,D) select — hides under the tile DMA.
        row = i * tn + lax.broadcasted_iota(jnp.int32, (tn, 1), 0)
        valid = row < n_valid
        scores = jnp.where(valid, scores, -jnp.inf)
        x = jnp.where(valid, x, jnp.zeros_like(x))

    # --- online softmax update ------------------------------------------------
    tile_max = jnp.max(scores, axis=0, keepdims=True)           # (1, 1)
    m_new = jnp.maximum(m_sc[...], tile_max)                    # (1, 1)
    alpha = jnp.exp(m_sc[...] - m_new)                          # rescale old acc
    e = jnp.exp(scores - m_new)                                 # (TN, 1) f32

    l_sc[...] = alpha * l_sc[...] + jnp.sum(e, axis=0, keepdims=True)

    # MXU contraction over the node axis: (TN,1)^T @ (TN,D) -> (1, D).
    # Keep the exp-scores in f32 (accuracy; costs nothing at ~1 flop/byte).
    pooled = lax.dot_general(
        e, x.astype(jnp.float32),
        (((0,), (0,)), ((), ())),
        preferred_element_type=jnp.float32)
    acc_sc[...] = alpha * acc_sc[...] + pooled
    m_sc[...] = m_new

    # --- finalize on last tile: one exact normalization of the (1, D) slab ----
    @pl.when(i == pl.num_programs(0) - 1)
    def _():
        # Exact division (approx reciprocal's ~2^-12 error fails 1e-5 tol).
        out_ref[...] = (acc_sc[...] / l_sc[...]).astype(out_ref.dtype)


def _choose_tile_n(n, d, itemsize, budget_bytes=12 << 20):
    """Biggest N-tile whose double-buffered x stream fits a VMEM budget.

    12 MiB keeps 2 * tn * D * itemsize inside every generation's default
    scoped VMEM (16 MiB v5e, 32 MiB v6e/v7x) and well under v7x's 64 MiB
    physical VMEM, while the >=512-row floor keeps the ~0.35 us per-grid-step
    overhead negligible.
    """
    tn = budget_bytes // (2 * d * itemsize)
    tn = max(512, (tn // 8) * 8)          # multiple of 8 -> (8, 128) rule
    return n if tn >= n else tn


def attention_pool(node_features, weight, bias=None, *, tile_n=None):
    """node_features: (N, D); weight: (1, D) (PyTorch Linear layout); bias is
    ignored on purpose (softmax over dim=0 is shift-invariant)."""
    del bias
    N, D = node_features.shape
    itemsize = jnp.dtype(node_features.dtype).itemsize

    # PyTorch Linear stores weight as (out_features, in_features) = (1, D);
    # forward uses x @ weight.T, so present it as (D, 1).
    w = weight.reshape(1, D).T

    if tile_n is None:
        tn = _choose_tile_n(N, D, itemsize)
    else:
        tn = min(int(tile_n), N)
        if tn != N:
            assert tn % 8 == 0, "tile_n must be a multiple of 8 (or >= N)"

    grid_n = pl.cdiv(N, tn)
    needs_mask = (grid_n * tn != N)       # only the last (partial) tile

    kernel = functools.partial(
        attention_pool_kernel, n_valid=N, tn=tn, needs_mask=needs_mask)

    # HBM-bound kernel (~1 flop/byte f32); hint XLA's scheduler.
    cost = pl.CostEstimate(
        flops=4 * N * D,                       # score matmul + pooled contraction
        transcendentals=N,                     # one exp per node
        bytes_accessed=N * D * itemsize + 2 * D * itemsize)

    out = pl.pallas_call(
        kernel,
        out_shape=jax.ShapeDtypeStruct((1, D), node_features.dtype),
        grid_spec=pltpu.PrefetchScalarGridSpec(
            num_scalar_prefetch=0,
            grid=(grid_n,),
            in_specs=[
                pl.BlockSpec((tn, D), lambda i: (i, 0)),   # streamed x tiles
                pl.BlockSpec((D, 1), lambda i: (0, 0)),    # w resident
            ],
            out_specs=pl.BlockSpec((1, D), lambda i: (0, 0)),  # accumulator out
            scratch_shapes=[
                pltpu.VMEM((1, 1), jnp.float32),   # running max m
                pltpu.VMEM((1, 1), jnp.float32),   # running denom l
                pltpu.VMEM((1, D), jnp.float32),   # running weighted sum
            ],
        ),
        compiler_params=pltpu.CompilerParams(
            # Single grid axis is the N-reduction -> must stay "arbitrary".
            dimension_semantics=("arbitrary",),
            # 12 MiB double-buffer budget + slack; safe on every generation
            # (v5e/v6e: 128 MiB physical; v7x: 64 MiB physical).
            vmem_limit_bytes=32 * 1024 * 1024),
        cost_estimate=cost,
    )(node_features, w)
    return out.reshape(D)


def attention_pool_ref(node_features, weight, bias):
    scores = node_features @ weight.reshape(1, -1).T + bias.reshape(1, 1)
    scores = jax.nn.softmax(scores, axis=0)
    return jnp.sum(scores * node_features, axis=0)


if __name__ == "__main__":
    key = jax.random.PRNGKey(0)
    k1, k2, k3 = jax.random.split(key, 3)

    N, D = 16, 32  # 16 nodes, 32-dim node features
    node_features = jax.random.normal(k1, (N, D), dtype=jnp.float32)
    # Deterministic init mimicking nn.Linear(D, 1): weight (1, D), bias (1,)
    bound = 1.0 / jnp.sqrt(D)
    weight = jax.random.uniform(k2, (1, D), minval=-bound, maxval=bound,
                                dtype=jnp.float32)
    bias = jax.random.uniform(k3, (1,), minval=-bound, maxval=bound,
                              dtype=jnp.float32)

    ref = attention_pool_ref(node_features, weight, bias)

    # Default path: budget-derived tile covers all nodes in a single block.
    out = jax.block_until_ready(attention_pool(node_features, weight, bias))
    assert out.shape == (D,)
    assert jnp.allclose(out, ref, atol=1e-5, rtol=1e-5), (out, ref)

    # Multi-tile online-softmax path (2 full tiles of 8 nodes).
    out_tiled = jax.block_until_ready(
        attention_pool(node_features, weight, bias, tile_n=8))
    assert jnp.allclose(out_tiled, ref, atol=1e-5, rtol=1e-5), (out_tiled, ref)

    # Ragged path: N not a multiple of the tile -> cdiv grid + in-kernel tail
    # mask (no wrapper-side padding copy).
    N2 = 19
    nf2 = jax.random.normal(jax.random.PRNGKey(1), (N2, D), dtype=jnp.float32)
    ref2 = attention_pool_ref(nf2, weight, bias)
    out2 = jax.block_until_ready(attention_pool(nf2, weight, bias, tile_n=8))
    assert jnp.allclose(out2, ref2, atol=1e-5, rtol=1e-5), (out2, ref2)

    print("KERNEL_OK")
</pallas_src>

<mosaic_0001>
module attributes {stable_mosaic.version = 11 : i64} {
  func.func @attention_pool_kernel(%arg0: i32, %arg1: memref<16x32xf32, #tpu.memory_space<vmem>>, %arg2: memref<32x1xf32, #tpu.memory_space<vmem>>, %arg3: memref<1x32xf32, #tpu.memory_space<vmem>>, %arg4: memref<1x1xf32, #tpu.memory_space<vmem>>, %arg5: memref<1x1xf32, #tpu.memory_space<vmem>>, %arg6: memref<1x32xf32, #tpu.memory_space<vmem>>) attributes {dimension_semantics = [#tpu.dimension_semantics<arbitrary>], iteration_bounds = array<i64: 1>, scalar_prefetch = 0 : i64, scratch_operands = 3 : i64, tpu.core_type = #tpu.core_type<tc>, window_params = [{transform_indices = @transform_0, window_bounds = array<i64: 16, 32>}, {pipeline_mode = #tpu.pipeline_mode<synchronous>, transform_indices = @transform_1, window_bounds = array<i64: 32, 1>}, {pipeline_mode = #tpu.pipeline_mode<synchronous>, transform_indices = @transform_2, window_bounds = array<i64: 1, 32>}]} {
    %c0_i32 = arith.constant 0 : i32
    %0 = arith.cmpi eq, %arg0, %c0_i32 : i32
    %1 = arith.extui %0 : i1 to i32
    %c0_i32_0 = arith.constant 0 : i32
    %2 = arith.cmpi ne, %1, %c0_i32_0 : i32
    scf.if %2 {
      %cst_23 = arith.constant 0xFF800000 : f32
      %32 = vector.broadcast %cst_23 : f32 to vector<1x1xf32>
      %c0_24 = arith.constant 0 : index
      %c0_25 = arith.constant 0 : index
      %33 = vector.load %arg4[%c0_24, %c0_25] : memref<1x1xf32, #tpu.memory_space<vmem>>, vector<1x1xf32>
      tpu.vector_store %arg4[%c0_24, %c0_25], %32 {strides = array<i32>} : memref<1x1xf32, #tpu.memory_space<vmem>>, vector<1x1xf32>,
      %cst_26 = arith.constant 0.000000e+00 : f32
      %34 = vector.broadcast %cst_26 : f32 to vector<1x1xf32>
      %c0_27 = arith.constant 0 : index
      %c0_28 = arith.constant 0 : index
      %35 = vector.load %arg5[%c0_27, %c0_28] : memref<1x1xf32, #tpu.memory_space<vmem>>, vector<1x1xf32>
      tpu.vector_store %arg5[%c0_27, %c0_28], %34 {strides = array<i32>} : memref<1x1xf32, #tpu.memory_space<vmem>>, vector<1x1xf32>,
      %cst_29 = arith.constant 0.000000e+00 : f32
      %36 = vector.broadcast %cst_29 : f32 to vector<1x32xf32>
      %c0_30 = arith.constant 0 : index
      %c0_31 = arith.constant 0 : index
      %37 = vector.load %arg6[%c0_30, %c0_31] : memref<1x32xf32, #tpu.memory_space<vmem>>, vector<1x32xf32>
      tpu.vector_store %arg6[%c0_30, %c0_31], %36 {strides = array<i32>} : memref<1x32xf32, #tpu.memory_space<vmem>>, vector<1x32xf32>,
    } else {
    }
    %c0 = arith.constant 0 : index
    %c0_1 = arith.constant 0 : index
    %3 = vector.load %arg1[%c0, %c0_1] : memref<16x32xf32, #tpu.memory_space<vmem>>, vector<16x32xf32>
    %c0_2 = arith.constant 0 : index
    %c0_3 = arith.constant 0 : index
    %4 = vector.load %arg2[%c0_2, %c0_3] : memref<32x1xf32, #tpu.memory_space<vmem>>, vector<32x1xf32>
    %cst = arith.constant dense<0.000000e+00> : vector<16x1xf32>
    %5 = tpu.matmul %3, %4, %cst {dimension_numbers = #tpu.dot_dimension_numbers<[1], [0], [0], [1], [0, 0, 1, 1], [], []>} : vector<16x32xf32>, vector<32x1xf32>, vector<16x1xf32> -> vector<16x1xf32>
    %cst_4 = arith.constant dense<0xFF800000> : vector<1xf32>
    %6 = vector.multi_reduction <maximumf>, %5, %cst_4 [0] : vector<16x1xf32> to vector<1xf32>
    %7 = vector.shape_cast %6 : vector<1xf32> to vector<1x1xf32>
    %c0_5 = arith.constant 0 : index
    %c0_6 = arith.constant 0 : index
    %8 = vector.load %arg4[%c0_5, %c0_6] : memref<1x1xf32, #tpu.memory_space<vmem>>, vector<1x1xf32>
    %9 = arith.maximumf %8, %7 : vector<1x1xf32>
    %c0_7 = arith.constant 0 : index
    %c0_8 = arith.constant 0 : index
    %10 = vector.load %arg4[%c0_7, %c0_8] : memref<1x1xf32, #tpu.memory_space<vmem>>, vector<1x1xf32>
    %11 = arith.subf %10, %9 : vector<1x1xf32>
    %12 = math.exp %11 : vector<1x1xf32>
    %13 = vector.broadcast %9 : vector<1x1xf32> to vector<16x1xf32>
    %14 = arith.subf %5, %13 : vector<16x1xf32>
    %15 = math.exp %14 : vector<16x1xf32>
    %c0_9 = arith.constant 0 : index
    %c0_10 = arith.constant 0 : index
    %16 = vector.load %arg5[%c0_9, %c0_10] : memref<1x1xf32, #tpu.memory_space<vmem>>, vector<1x1xf32>
    %17 = arith.mulf %12, %16 : vector<1x1xf32>
    %cst_11 = arith.constant dense<0.000000e+00> : vector<1xf32>
    %18 = vector.multi_reduction <add>, %15, %cst_11 [0] : vector<16x1xf32> to vector<1xf32>
    %19 = vector.shape_cast %18 : vector<1xf32> to vector<1x1xf32>
    %20 = arith.addf %17, %19 : vector<1x1xf32>
    %c0_12 = arith.constant 0 : index
    %c0_13 = arith.constant 0 : index
    %21 = vector.load %arg5[%c0_12, %c0_13] : memref<1x1xf32, #tpu.memory_space<vmem>>, vector<1x1xf32>
    tpu.vector_store %arg5[%c0_12, %c0_13], %20 {strides = array<i32>} : memref<1x1xf32, #tpu.memory_space<vmem>>, vector<1x1xf32>,
    %cst_14 = arith.constant dense<0.000000e+00> : vector<1x32xf32>
    %22 = tpu.matmul %15, %3, %cst_14 {dimension_numbers = #tpu.dot_dimension_numbers<[0], [0], [1], [1], [0, 1, 1, 1], [], []>} : vector<16x1xf32>, vector<16x32xf32>, vector<1x32xf32> -> vector<1x32xf32>
    %c0_15 = arith.constant 0 : index
    %c0_16 = arith.constant 0 : index
    %23 = vector.load %arg6[%c0_15, %c0_16] : memref<1x32xf32, #tpu.memory_space<vmem>>, vector<1x32xf32>
    %24 = vector.broadcast %12 : vector<1x1xf32> to vector<1x32xf32>
    %25 = arith.mulf %24, %23 : vector<1x32xf32>
    %26 = arith.addf %25, %22 : vector<1x32xf32>
    %c0_17 = arith.constant 0 : index
    %c0_18 = arith.constant 0 : index
    %27 = vector.load %arg6[%c0_17, %c0_18] : memref<1x32xf32, #tpu.memory_space<vmem>>, vector<1x32xf32>
    tpu.vector_store %arg6[%c0_17, %c0_18], %26 {strides = array<i32>} : memref<1x32xf32, #tpu.memory_space<vmem>>, vector<1x32xf32>,
    %c0_19 = arith.constant 0 : index
    %c0_20 = arith.constant 0 : index
    %28 = vector.load %arg4[%c0_19, %c0_20] : memref<1x1xf32, #tpu.memory_space<vmem>>, vector<1x1xf32>
    tpu.vector_store %arg4[%c0_19, %c0_20], %9 {strides = array<i32>} : memref<1x1xf32, #tpu.memory_space<vmem>>, vector<1x1xf32>,
    %c0_i32_21 = arith.constant 0 : i32
    %29 = arith.cmpi eq, %arg0, %c0_i32_21 : i32
    %30 = arith.extui %29 : i1 to i32
    %c0_i32_22 = arith.constant 0 : i32
    %31 = arith.cmpi ne, %30, %c0_i32_22 : i32
    scf.if %31 {
      %c0_23 = arith.constant 0 : index
      %c0_24 = arith.constant 0 : index
      %32 = vector.load %arg6[%c0_23, %c0_24] : memref<1x32xf32, #tpu.memory_space<vmem>>, vector<1x32xf32>
      %c0_25 = arith.constant 0 : index
      %c0_26 = arith.constant 0 : index
      %33 = vector.load %arg5[%c0_25, %c0_26] : memref<1x1xf32, #tpu.memory_space<vmem>>, vector<1x1xf32>
      %34 = vector.broadcast %33 : vector<1x1xf32> to vector<1x32xf32>
      %35 = arith.divf %32, %34 : vector<1x32xf32>
      %c0_27 = arith.constant 0 : index
      %c0_28 = arith.constant 0 : index
      %36 = vector.load %arg3[%c0_27, %c0_28] : memref<1x32xf32, #tpu.memory_space<vmem>>, vector<1x32xf32>
      tpu.vector_store %arg3[%c0_27, %c0_28], %35 {strides = array<i32>} : memref<1x32xf32, #tpu.memory_space<vmem>>, vector<1x32xf32>,
    } else {
    }
    return
  }
  func.func @transform_0(%arg0: i32) -> (i32, i32) {
    %c0_i32 = arith.constant 0 : i32
    %c0_i32_0 = arith.constant 0 : i32
    return %arg0, %c0_i32 : i32, i32
  }
  func.func @transform_1(%arg0: i32) -> (i32, i32) {
    %c0_i32 = arith.constant 0 : i32
    %c0_i32_0 = arith.constant 0 : i32
    %c0_i32_1 = arith.constant 0 : i32
    return %c0_i32, %c0_i32_0 : i32, i32
  }
  func.func @transform_2(%arg0: i32) -> (i32, i32) {
    %c0_i32 = arith.constant 0 : i32
    %c0_i32_0 = arith.constant 0 : i32
    %c0_i32_1 = arith.constant 0 : i32
    return %c0_i32, %c0_i32_0 : i32, i32
  }
}

</mosaic_0001>

<bundles_post_ra>
// kernel: tpu_custom_call.1
= control target key start
LH: loop header
LB: loop body
LE: loop exit
PB: predicated region body
PF: predicated region fallthrough
CT: control target
= control target key end

     0   :  { %vm27_vm0 = vcmask 261120   ;;  %s445_s0 = inlined_call_operand.vmem [shape: f32[16,32], index: 0, kind: input, shape index: {}]   ;;  %s446_s1 = inlined_call_operand.vmem [shape: f32[32,1], index: 1, kind: input, shape index: {}]   ;;  %s447_s2 = inlined_call_operand.hbm [shape: f32[1,32], index: 2, kind: output, shape index: {}]  }
   0x1   :  { %v23_v0 = vld [vmem:[%s446_s1] sm:$0xff]  ;;  %v24_v1 = vld [vmem:[%s446_s1 + $0x8] sm:$0xff]  ;;  %v25_v2 = vld [vmem:[%s446_s1 + $0x10] sm:$0xff] }
   0x2   :  { %v332_v3 = vpack.c.bf16 %v24_v1, %v23_v0  ;;  %v26_v4 = vld [vmem:[%s446_s1 + $0x18] sm:$0xff]  ;;  %v21_v5 = vld [vmem:[%s445_s0] sm:$0xff] }
   0x3   :  { %v336_v6 = vpack.c.bf16 %v26_v4, %v25_v2  ;;  %322 = vmatprep.mubr.msk.f32.mxu0 %vm27_vm0, %v21_v5 }
   0x4   :  { %7 = vsyncpa [#allocation6], 0  ;;  %333 = vmatprep.subr.bf16.mxu0 %v332_v3  ;;  %v22_v7 = vld [vmem:[%s445_s0 + $0x8] sm:$0xff]  ;;  %vm16_vm1 = vcmask 0   ;;  %v383_v8 = vmov -inf   ;;  %v384_v9 = vmov 0.0   ;;  %v125_v19 = vlaneseq }
   0x5   :  { %335 = vmatpush3.bf16.msra.mxu0 %v332_v3  ;;  %17 = vst.msk [vmem:[#allocation2] sm:$0x1] %vm16_vm1, %v383_v8  ;;  %18 = vst.msk [vmem:[#allocation3] sm:$0x1] %vm16_vm1, %v384_v9  ;;  %v385_v10 = vmov 0   ;;  %v386_v11 = vmov 0.0|0.0   ;;  %v341_v36 = vpack.c.bf16 %v22_v7, %v21_v5 }
   0x6   :  { %337 = vmatprep.subr.bf16.mxu0 %v336_v6  ;;  %349 = vset.pattern.permute.xlu1 %v385_v10  ;;  %vm109_vm2 = vcmask 7168   ;;  %v126_v22 = vshrl.u32 %v125_v19, 7  ;;  %vm19_vm3 = vcmask 253952   ;;  %vm387_vm4 = vmmov 0   ;;  %s388_s0 = smov [#allocation5]  }
   0x7   :  { %340 = vmatprep.subr.bf16.mxu1 %v386_v11  ;;  %20 = vst.msk [vmem:[#allocation4] sm:$0x1] %vm19_vm3, %v384_v9  ;;  %329 = vmatprep.mubr.msk.f32.mxu1 %vm387_vm4, %v384_v9  ;;  %vm182_vm5 = vcmask 130048   ;;  %s294_s1 = sshll.u32 %s388_s0, 4  ;;  %s295_s1 = int_to_ptr.vmem [resolvable:$true] %s294_s1 }
   0x8   :  { %v127_v26 = vsub.s32 0, %v126_v22  ;;  %342 = vmatpush3.bf16.msra.mxu1 %v341_v36  ;;  %s359_s21 = scalar_lea.vmem %s295_s1, 16  ;;  %s363_s22 = scalar_lea.vmem %s295_s1, 32 }
   0x9   :  { %339 = vmatpush3.bf16.msra.mxu0 %v336_v6  ;;  %p360_p0 = scmp.ne.s32.totalorder %s295_s1, %s359_s21  ;;  %p364_p1 = scmp.lt.s32.totalorder %s295_s1, %s295_s1 }
   0xa   :  { %p365_p2 = scmp.lt.s32.totalorder %s363_s22, %s359_s21 }
   0xc   :  { %323 = vmatmul.mubr.msk.f32.vlgmr.msra.gmra.mrb[0].mxu0 %vm27_vm0, %v22_v7  ;;  %v119_v24 = vld [vmem:[#allocation2] sm:$0x1]  ;;  %v136_v46 = vld [vmem:[#allocation3] sm:$0x1]  ;;  %p366_p3 = por %p365_p2, %p364_p1 }
   0xe   :  { %v256_v57 = vld [vmem:[#allocation4] sm:$0x1]  ;;  %p367_p4 = pnand %p366_p3, %p360_p0 }
  0xdf   :  { %v324_v12 = vpop.f32.mrb[0].mxu0 }
  0xe0   :  { %v111_v13 = vsel %vm109_vm2, %v324_v12, -inf  ;;  %v100_v14 = vpop.f32.mrb[1].mxu0 }
  0xe1   :  { %v110_v15 = vsel %vm109_vm2, %v100_v14, -inf }
  0xe2   :  { %v112_v16 = vmax.f32 %v110_v15, %v111_v13 }
  0xe4   :  { %v113_v17 = vrot.slane %v112_v16, 4 }
  0xe6   :  { %v114_v18 = vmax.f32 %v112_v16, %v113_v17 }
  0xe8   :  { %v115_v20 = vrot.slane %v114_v18, 2 }
  0xea   :  { %v116_v21 = vmax.f32 %v114_v18, %v115_v20 }
  0xec   :  { %v117_v23 = vrot.slane %v116_v21, 1 }
  0xee   :  { %v118_v25 = vmax.f32 %v116_v21, %v117_v23 }
  0xf0   :  { %v120_v27 = vmax.f32 %v119_v24, %v118_v25 }
  0xf2   :  { %v128_v28 = vrot.slane %v120_v27, %v127_v26  ;;  %270 = vst.msk [vmem:[#allocation2] sm:$0x1] %vm16_vm1, %v120_v27  ;;  %v121_v29 = vsub.f32 %v119_v24, %v120_v27 }
  0xf4   :  { %v130_v30 = vsub.f32 %v100_v14, %v128_v28  ;;  %v131_v31 = vsub.f32 %v324_v12, %v128_v28  ;;  %v122_v32 = vmul.f32 1.442695, %v121_v29 }
  0xf6   :  { %v132_v33 = vmul.f32 1.442695, %v130_v30  ;;  %v134_v34 = vmul.f32 1.442695, %v131_v31  ;;  %351 = vpow2.f32 %v122_v32 }
  0xf8   :  { %353 = vpow2.f32 %v132_v33 }
  0xf9   :  { %355 = vpow2.f32 %v134_v34 }
 0x100   :  { %v352_v35 = vpop.eup %351 }
 0x101   :  { %259 = vperm.xlu1 %349, %v352_v35   ;;  %v137_v49 = vmul.f32 %v352_v35, %v136_v46 }
 0x102   :  { %v354_v37 = vpop.eup %353 }
 0x103   :  { %v356_v38 = vpop.eup %355  ;;  %v138_v39 = vsel %vm109_vm2, %v354_v37, 0.0  ;;  %150 = vxpose.xlu0.b32.start [1/2] (short) (narrow) %v354_v37, 8 }
 0x104   :  { %v139_v40 = vsel %vm109_vm2, %v356_v38, 0.0 }
 0x105   :  { %v140_v41 = vadd.f32 %v139_v40, %v138_v39 }
 0x107   :  { %v141_v42 = vrot.slane %v140_v41, 4  ;;  %151 = vxpose.xlu0.b32.end [2/2] (short) (narrow) %v356_v38, 8 }
 0x109   :  { %v142_v43 = vadd.f32 %v141_v42, %v140_v41 }
 0x10b   :  { %v143_v44 = vrot.slane %v142_v43, 2 }
 0x10d   :  { %v144_v45 = vadd.f32 %v143_v44, %v142_v43 }
 0x10f   :  { %v145_v47 = vrot.slane %v144_v45, 1 }
 0x111   :  { %v146_v48 = vadd.f32 %v145_v47, %v144_v45 }
 0x113   :  { %v147_v50 = vadd.f32 %v146_v48, %v137_v49 }
 0x115   :  { %149 = vst.msk [vmem:[#allocation3] sm:$0x1] %vm16_vm1, %v147_v50 }
 0x11c   :  { %v275_v51 = vld [vmem:[#allocation3] sm:$0x1] }
 0x11d   :  { %278 = vperm.xlu1 %349, %v275_v51  }
 0x130   :  { %350 = vset.pattern.permute.xlu0 %v385_v10 }
 0x180   :  { %v260_v53 = vpop.permute.xlu1 %259 }
 0x181   :  { %v265_v55 = vrot.slane %v260_v53, %v127_v26 }
 0x183   :  { %v166_v52 = vpop.trf.xlu0  ;;  %v266_v58 = vmul.f32 %v265_v55, %v256_v57 }
 0x184   :  { %330 = vmatmul.mubr.msk.f32.vlgmr.msra.gmra.mrb[0].mxu1 %vm182_vm5, %v166_v52 }
 0x19c   :  { %v279_v54 = vpop.permute.xlu1 %278 }
 0x19d   :  { %v284_v56 = vrot.slane %v279_v54, %v127_v26 }
 0x19f   :  { %357 = vrcp.f32 %v284_v56 }
 0x1a9   :  { %v358_v62 = vpop.eup %357 }
 0x257   :  { %v252_v59 = vpop.f32.mrb[0].mxu1 }
 0x258   :  { %v267_v60 = vadd.f32 %v266_v58, %v252_v59  ;;  %v331_v61 = vpop.f32.mrb[1].mxu1 }
 0x25a   :  { %269 = vst.msk [vmem:[#allocation4] sm:$0x1] %vm19_vm3, %v267_v60 }
 0x261   :  { %v274_v63 = vld [vmem:[#allocation4] sm:$0x1] }
 0x262   :  { %v286_v0 = vmul.f32 %v358_v62, %v274_v63 }
 0x264   :  { %287 = vst.msk [vmem:[#allocation5] sm:$0x1] %vm19_vm3, %v286_v0 }
 0x265   :  { %370 = shalt.err (!%p367_p4)
}
 0x266   :  { %s371_s25 = scalar_lea.hbm %s447_s2, 16 }
 0x267   :  { %p372_p5 = scmp.ne.s32.totalorder %s447_s2, %s371_s25  ;;  %p375_p6 = scmp.lt.u32.totalorder %s371_s25, %s447_s2 }
 0x269   :  { %p377_p7 = pnand %p375_p6, %p372_p5 }
 0x26b   :  { %380 = shalt.err (!%p377_p7)
}
 0x26c   :  { %297 = dma.vmem_to_hbm [thread:$0]  %s295_s1, 16, %s447_s2, [#allocation6]  }
 0x26d   :  { %381 = dma.done.wait [#allocation6], 16  }
 0x26e   :  { %382 = vsyncadd [#allocation6], 4294967280 }
 0x26f   :  { %301 = vsyncpa [#allocation6], 1 }

</bundles_post_ra>
